<compile_context>
chip_gen: v7x
topology: tpu7x:2x2x1
jax: 0.10.0
libtpu: 0.0.40
codegen_flags: <defaults>
</compile_context>

<pallas_src>
import functools
import math

import jax
import jax.numpy as jnp
from jax.experimental import pallas as pl
from jax.experimental.pallas import tpu as pltpu


def _value_net_kernel(x_ref, w1_ref, b1_ref, w2a_ref, b2a_ref,
                      w2b_ref, b2b_ref, w3_ref, b3_ref, o_ref, *, use_bf16):
    cdt = jnp.bfloat16 if use_bf16 else jnp.float32
    x = x_ref[...].astype(cdt)

    # linear1 + ReLU
    h = jnp.dot(x, w1_ref[...].astype(cdt),
                preferred_element_type=jnp.float32) + b1_ref[...]
    h = jnp.maximum(h, 0.0)

    # linear2 = Linear -> ELU -> Linear, followed by ReLU (from forward())
    z = jnp.dot(h.astype(cdt), w2a_ref[...].astype(cdt),
                preferred_element_type=jnp.float32) + b2a_ref[...]
    # ELU(alpha=1); clamp so the unselected exp never overflows for large +z.
    z = jnp.where(z > 0.0, z, jnp.exp(jnp.minimum(z, 0.0)) - 1.0)

    h2 = jnp.dot(z.astype(cdt), w2b_ref[...].astype(cdt),
                 preferred_element_type=jnp.float32) + b2b_ref[...]
    h2 = jnp.maximum(h2, 0.0)

    # linear3 (out_features=1): VPU multiply + lane reduction instead of an
    # N=1 MXU matmul; emit a lane-dense [1, TILE_B] row.
    v = jnp.sum(h2 * w3_ref[...], axis=-1) + b3_ref[0, 0]     # [TILE_B]
    o_ref[...] = v.reshape(1, -1)                             # [1, TILE_B]


def _round_up(x, m):
    return ((x + m - 1) // m) * m


def value_network_forward(state, params, *, use_bf16=False, tile_b=256):
    """state: [B, num_inputs] float32 -> [B, 1] float32."""
    B, num_inputs = state.shape
    H = params["w1"].shape[1]

    # Batch tiling: single aligned tile for small B, otherwise 128-multiple
    # tiles (lane-dense output blocks require TILE_B % 128 == 0 when tiled).
    if B <= tile_b:
        TILE_B = _round_up(max(B, 1), 8)
    else:
        assert tile_b % 128 == 0, "tile_b must be a multiple of 128 when B > tile_b"
        TILE_B = tile_b
    B_pad = _round_up(B, TILE_B)
    num_tiles = B_pad // TILE_B

    if B_pad != B:
        state = jnp.pad(state, ((0, B_pad - B), (0, 0)))

    w1, w2a, w2b = params["w1"], params["w2a"], params["w2b"]
    if use_bf16:  # halve weight DMA bytes + feed the MXU bf16 natively (v6e/v7x)
        w1, w2a, w2b = (w.astype(jnp.bfloat16) for w in (w1, w2a, w2b))

    args = (state, w1, params["b1"], w2a, params["b2a"],
            w2b, params["b2b"], params["w3"], params["b3"])

    def pinned(shape):  # weights/biases: same block every grid step -> VMEM-resident
        return pl.BlockSpec(shape, lambda i: (0, 0))

    in_specs = [
        pl.BlockSpec((TILE_B, num_inputs), lambda i: (i, 0)),   # state (batch-tiled)
        pinned((num_inputs, H)),                                # w1
        pinned((1, H)),                                         # b1
        pinned((H, 2 * H)),                                     # w2a
        pinned((1, 2 * H)),                                     # b2a
        pinned((2 * H, H)),                                     # w2b
        pinned((1, H)),                                         # b2b
        pinned((1, H)),                                         # w3 (row vector)
        pl.BlockSpec((1, 1), lambda i: (0, 0),
                     memory_space=pltpu.MemorySpace.SMEM),      # b3 scalar
    ]
    out_specs = pl.BlockSpec((1, TILE_B), lambda i: (0, i))

    wbytes = sum(int(w.size) * w.dtype.itemsize for w in (w1, w2a, w2b))
    cost = pl.CostEstimate(
        flops=int(2 * B_pad * (num_inputs * H + 4 * H * H + H)),
        transcendentals=int(B_pad * 2 * H),
        bytes_accessed=int(4 * B_pad * (num_inputs + 1) + wbytes + 4 * (4 * H + 1)),
    )

    out = pl.pallas_call(
        functools.partial(_value_net_kernel, use_bf16=use_bf16),
        out_shape=jax.ShapeDtypeStruct((1, B_pad), jnp.float32),
        grid=(num_tiles,),
        in_specs=in_specs,
        out_specs=out_specs,
        compiler_params=pltpu.CompilerParams(
            dimension_semantics=("parallel",)),
        cost_estimate=cost,
    )(*args)

    return out[0, :B][:, None]                                  # [B, 1]


def _xavier_uniform(key, fan_in, fan_out, gain=1.0):
    # Matches torch.nn.init.xavier_uniform_; stored as [in, out] so kernel does x @ W.
    bound = gain * math.sqrt(6.0 / (fan_in + fan_out))
    return jax.random.uniform(key, (fan_in, fan_out), jnp.float32, -bound, bound)


def init_value_network_params(key, num_inputs, hidden_dim):
    k1, k2, k3, k4 = jax.random.split(key, 4)
    bound3 = math.sqrt(6.0 / (hidden_dim + 1))
    return {
        "w1":  _xavier_uniform(k1, num_inputs, hidden_dim),
        "b1":  jnp.zeros((1, hidden_dim), jnp.float32),
        "w2a": _xavier_uniform(k2, hidden_dim, hidden_dim * 2),
        "b2a": jnp.zeros((1, hidden_dim * 2), jnp.float32),
        "w2b": _xavier_uniform(k3, hidden_dim * 2, hidden_dim),
        "b2b": jnp.zeros((1, hidden_dim), jnp.float32),
        # linear3 weight kept as a [1, H] row for the lane-dense reduction.
        "w3":  jax.random.uniform(k4, (1, hidden_dim), jnp.float32, -bound3, bound3),
        "b3":  jnp.zeros((1, 1), jnp.float32),
    }


def value_network_ref(state, p):
    """Pure-JAX reference of the same forward pass (for correctness check)."""
    h = jnp.maximum(state @ p["w1"] + p["b1"], 0.0)
    z = h @ p["w2a"] + p["b2a"]
    z = jnp.where(z > 0.0, z, jnp.exp(jnp.minimum(z, 0.0)) - 1.0)
    h2 = jnp.maximum(z @ p["w2b"] + p["b2b"], 0.0)
    return h2 @ p["w3"].T + p["b3"]


if __name__ == "__main__":
    num_inputs, hidden_dim = 16, 32

    key = jax.random.PRNGKey(0)
    k_params, k_s1, k_s2 = jax.random.split(key, 3)
    params = init_value_network_params(k_params, num_inputs, hidden_dim)

    # 1) Small single-tile batch, f32 compute.
    state = jax.random.normal(k_s1, (8, num_inputs), jnp.float32)
    out = jax.block_until_ready(value_network_forward(state, params))
    ref = value_network_ref(state, params)
    assert out.shape == (8, 1), out.shape
    assert jnp.allclose(out, ref, atol=1e-5, rtol=1e-5), "f32 mismatch vs reference"

    # 2) Multi-tile batch (exercises grid, resident weights, batch padding).
    state2 = jax.random.normal(k_s2, (272, num_inputs), jnp.float32)
    out2 = jax.block_until_ready(value_network_forward(state2, params, tile_b=128))
    ref2 = value_network_ref(state2, params)
    assert out2.shape == (272, 1), out2.shape
    assert jnp.allclose(out2, ref2, atol=1e-5, rtol=1e-5), "tiled mismatch vs reference"

    # 3) bf16 hidden matmuls (v6e/v7x MXU fast path), f32 accumulation.
    out3 = jax.block_until_ready(
        value_network_forward(state2, params, use_bf16=True, tile_b=128))
    assert jnp.allclose(out3, ref2, atol=5e-2, rtol=5e-2), "bf16 mismatch vs reference"

    print("KERNEL_OK")
</pallas_src>

<mosaic_0001>
module attributes {stable_mosaic.version = 11 : i64} {
  func.func @_value_net_kernel(%arg0: i32, %arg1: memref<8x16xf32, #tpu.memory_space<vmem>>, %arg2: memref<16x32xf32, #tpu.memory_space<vmem>>, %arg3: memref<1x32xf32, #tpu.memory_space<vmem>>, %arg4: memref<32x64xf32, #tpu.memory_space<vmem>>, %arg5: memref<1x64xf32, #tpu.memory_space<vmem>>, %arg6: memref<64x32xf32, #tpu.memory_space<vmem>>, %arg7: memref<1x32xf32, #tpu.memory_space<vmem>>, %arg8: memref<1x32xf32, #tpu.memory_space<vmem>>, %arg9: memref<1x1xf32, #tpu.memory_space<smem>>, %arg10: memref<1x8xf32, #tpu.memory_space<vmem>>) attributes {dimension_semantics = [#tpu.dimension_semantics<parallel>], iteration_bounds = array<i64: 1>, scalar_prefetch = 0 : i64, scratch_operands = 0 : i64, tpu.core_type = #tpu.core_type<tc>, window_params = [{transform_indices = @transform_0, window_bounds = array<i64: 8, 16>}, {pipeline_mode = #tpu.pipeline_mode<synchronous>, transform_indices = @transform_1, window_bounds = array<i64: 16, 32>}, {pipeline_mode = #tpu.pipeline_mode<synchronous>, transform_indices = @transform_2, window_bounds = array<i64: 1, 32>}, {pipeline_mode = #tpu.pipeline_mode<synchronous>, transform_indices = @transform_3, window_bounds = array<i64: 32, 64>}, {pipeline_mode = #tpu.pipeline_mode<synchronous>, transform_indices = @transform_4, window_bounds = array<i64: 1, 64>}, {pipeline_mode = #tpu.pipeline_mode<synchronous>, transform_indices = @transform_5, window_bounds = array<i64: 64, 32>}, {pipeline_mode = #tpu.pipeline_mode<synchronous>, transform_indices = @transform_6, window_bounds = array<i64: 1, 32>}, {pipeline_mode = #tpu.pipeline_mode<synchronous>, transform_indices = @transform_7, window_bounds = array<i64: 1, 32>}, {transform_indices = @transform_8, window_bounds = array<i64: 1, 1>}, {transform_indices = @transform_9, window_bounds = array<i64: 1, 8>}]} {
    %c0 = arith.constant 0 : index
    %c0_0 = arith.constant 0 : index
    %0 = vector.load %arg1[%c0, %c0_0] : memref<8x16xf32, #tpu.memory_space<vmem>>, vector<8x16xf32>
    %c0_1 = arith.constant 0 : index
    %c0_2 = arith.constant 0 : index
    %1 = vector.load %arg2[%c0_1, %c0_2] : memref<16x32xf32, #tpu.memory_space<vmem>>, vector<16x32xf32>
    %cst = arith.constant dense<0.000000e+00> : vector<8x32xf32>
    %2 = tpu.matmul %0, %1, %cst {dimension_numbers = #tpu.dot_dimension_numbers<[1], [0], [0], [1], [0, 0, 1, 1], [], []>} : vector<8x16xf32>, vector<16x32xf32>, vector<8x32xf32> -> vector<8x32xf32>
    %c0_3 = arith.constant 0 : index
    %c0_4 = arith.constant 0 : index
    %3 = vector.load %arg3[%c0_3, %c0_4] : memref<1x32xf32, #tpu.memory_space<vmem>>, vector<1x32xf32>
    %4 = vector.broadcast %3 : vector<1x32xf32> to vector<8x32xf32>
    %5 = arith.addf %2, %4 : vector<8x32xf32>
    %cst_5 = arith.constant 0.000000e+00 : f32
    %6 = vector.broadcast %cst_5 : f32 to vector<8x32xf32>
    %7 = arith.maximumf %5, %6 : vector<8x32xf32>
    %c0_6 = arith.constant 0 : index
    %c0_7 = arith.constant 0 : index
    %8 = vector.load %arg4[%c0_6, %c0_7] : memref<32x64xf32, #tpu.memory_space<vmem>>, vector<32x64xf32>
    %cst_8 = arith.constant dense<0.000000e+00> : vector<8x64xf32>
    %9 = tpu.matmul %7, %8, %cst_8 {dimension_numbers = #tpu.dot_dimension_numbers<[1], [0], [0], [1], [0, 0, 1, 1], [], []>} : vector<8x32xf32>, vector<32x64xf32>, vector<8x64xf32> -> vector<8x64xf32>
    %c0_9 = arith.constant 0 : index
    %c0_10 = arith.constant 0 : index
    %10 = vector.load %arg5[%c0_9, %c0_10] : memref<1x64xf32, #tpu.memory_space<vmem>>, vector<1x64xf32>
    %11 = vector.broadcast %10 : vector<1x64xf32> to vector<8x64xf32>
    %12 = arith.addf %9, %11 : vector<8x64xf32>
    %cst_11 = arith.constant 0.000000e+00 : f32
    %13 = vector.broadcast %cst_11 : f32 to vector<8x64xf32>
    %14 = arith.cmpf ogt, %12, %13 : vector<8x64xf32>
    %cst_12 = arith.constant 0.000000e+00 : f32
    %15 = vector.broadcast %cst_12 : f32 to vector<8x64xf32>
    %16 = arith.minimumf %12, %15 : vector<8x64xf32>
    %17 = math.exp %16 : vector<8x64xf32>
    %cst_13 = arith.constant 1.000000e+00 : f32
    %18 = vector.broadcast %cst_13 : f32 to vector<8x64xf32>
    %19 = arith.subf %17, %18 : vector<8x64xf32>
    %20 = arith.select %14, %12, %19 : vector<8x64xi1>, vector<8x64xf32>
    %c0_14 = arith.constant 0 : index
    %c0_15 = arith.constant 0 : index
    %21 = vector.load %arg6[%c0_14, %c0_15] : memref<64x32xf32, #tpu.memory_space<vmem>>, vector<64x32xf32>
    %cst_16 = arith.constant dense<0.000000e+00> : vector<8x32xf32>
    %22 = tpu.matmul %20, %21, %cst_16 {dimension_numbers = #tpu.dot_dimension_numbers<[1], [0], [0], [1], [0, 0, 1, 1], [], []>} : vector<8x64xf32>, vector<64x32xf32>, vector<8x32xf32> -> vector<8x32xf32>
    %c0_17 = arith.constant 0 : index
    %c0_18 = arith.constant 0 : index
    %23 = vector.load %arg7[%c0_17, %c0_18] : memref<1x32xf32, #tpu.memory_space<vmem>>, vector<1x32xf32>
    %24 = vector.broadcast %23 : vector<1x32xf32> to vector<8x32xf32>
    %25 = arith.addf %22, %24 : vector<8x32xf32>
    %cst_19 = arith.constant 0.000000e+00 : f32
    %26 = vector.broadcast %cst_19 : f32 to vector<8x32xf32>
    %27 = arith.maximumf %25, %26 : vector<8x32xf32>
    %c0_20 = arith.constant 0 : index
    %c0_21 = arith.constant 0 : index
    %28 = vector.load %arg8[%c0_20, %c0_21] : memref<1x32xf32, #tpu.memory_space<vmem>>, vector<1x32xf32>
    %29 = vector.broadcast %28 : vector<1x32xf32> to vector<8x32xf32>
    %30 = arith.mulf %27, %29 : vector<8x32xf32>
    %cst_22 = arith.constant dense<0.000000e+00> : vector<8xf32>
    %31 = vector.multi_reduction <add>, %30, %cst_22 [1] : vector<8x32xf32> to vector<8xf32>
    %c0_23 = arith.constant 0 : index
    %c0_24 = arith.constant 0 : index
    %32 = memref.load %arg9[%c0_23, %c0_24] : memref<1x1xf32, #tpu.memory_space<smem>>
    %33 = vector.broadcast %32 : f32 to vector<8xf32>
    %34 = arith.addf %31, %33 : vector<8xf32>
    %35 = vector.shape_cast %34 : vector<8xf32> to vector<1x8xf32>
    %c0_25 = arith.constant 0 : index
    %c0_26 = arith.constant 0 : index
    %36 = vector.load %arg10[%c0_25, %c0_26] : memref<1x8xf32, #tpu.memory_space<vmem>>, vector<1x8xf32>
    tpu.vector_store %arg10[%c0_25, %c0_26], %35 {strides = array<i32>} : memref<1x8xf32, #tpu.memory_space<vmem>>, vector<1x8xf32>,
    return
  }
  func.func @transform_0(%arg0: i32) -> (i32, i32) {
    %c0_i32 = arith.constant 0 : i32
    %c0_i32_0 = arith.constant 0 : i32
    return %arg0, %c0_i32 : i32, i32
  }
  func.func @transform_1(%arg0: i32) -> (i32, i32) {
    %c0_i32 = arith.constant 0 : i32
    %c0_i32_0 = arith.constant 0 : i32
    %c0_i32_1 = arith.constant 0 : i32
    return %c0_i32, %c0_i32_0 : i32, i32
  }
  func.func @transform_2(%arg0: i32) -> (i32, i32) {
    %c0_i32 = arith.constant 0 : i32
    %c0_i32_0 = arith.constant 0 : i32
    %c0_i32_1 = arith.constant 0 : i32
    return %c0_i32, %c0_i32_0 : i32, i32
  }
  func.func @transform_3(%arg0: i32) -> (i32, i32) {
    %c0_i32 = arith.constant 0 : i32
    %c0_i32_0 = arith.constant 0 : i32
    %c0_i32_1 = arith.constant 0 : i32
    return %c0_i32, %c0_i32_0 : i32, i32
  }
  func.func @transform_4(%arg0: i32) -> (i32, i32) {
    %c0_i32 = arith.constant 0 : i32
    %c0_i32_0 = arith.constant 0 : i32
    %c0_i32_1 = arith.constant 0 : i32
    return %c0_i32, %c0_i32_0 : i32, i32
  }
  func.func @transform_5(%arg0: i32) -> (i32, i32) {
    %c0_i32 = arith.constant 0 : i32
    %c0_i32_0 = arith.constant 0 : i32
    %c0_i32_1 = arith.constant 0 : i32
    return %c0_i32, %c0_i32_0 : i32, i32
  }
  func.func @transform_6(%arg0: i32) -> (i32, i32) {
    %c0_i32 = arith.constant 0 : i32
    %c0_i32_0 = arith.constant 0 : i32
    %c0_i32_1 = arith.constant 0 : i32
    return %c0_i32, %c0_i32_0 : i32, i32
  }
  func.func @transform_7(%arg0: i32) -> (i32, i32) {
    %c0_i32 = arith.constant 0 : i32
    %c0_i32_0 = arith.constant 0 : i32
    %c0_i32_1 = arith.constant 0 : i32
    return %c0_i32, %c0_i32_0 : i32, i32
  }
  func.func @transform_8(%arg0: i32) -> (i32, i32) {
    %c0_i32 = arith.constant 0 : i32
    %c0_i32_0 = arith.constant 0 : i32
    %c0_i32_1 = arith.constant 0 : i32
    return %c0_i32, %c0_i32_0 : i32, i32
  }
  func.func @transform_9(%arg0: i32) -> (i32, i32) {
    %c0_i32 = arith.constant 0 : i32
    %c0_i32_0 = arith.constant 0 : i32
    return %c0_i32, %arg0 : i32, i32
  }
}

</mosaic_0001>

<bundles_post_ra>
// kernel: tpu_custom_call.1
= control target key start
LH: loop header
LB: loop body
LE: loop exit
PB: predicated region body
PF: predicated region fallthrough
CT: control target
= control target key end

     0   :  { %v451_v2 = vmov 0.0|0.0   ;;  %vm452_vm0 = vmmov 0   ;;  %v453_v4 = vmov 0.0   ;;  %s579_s0 = inlined_call_operand.vmem [shape: f32[8,16], index: 0, kind: input, shape index: {}]   ;;  %s580_s1 = inlined_call_operand.vmem [shape: f32[16,32], index: 1, kind: input, shape index: {}]   ;;  %s581_s2 = inlined_call_operand.vmem [shape: f32[1,32], index: 2, kind: input, shape index: {}]   ;;  %s582_s3 = inlined_call_operand.vmem [shape: f32[32,64], index: 3, kind: input, shape index: {}]   ;;  %s583_s4 = inlined_call_operand.vmem [shape: f32[1,64], index: 4, kind: input, shape index: {}]   ;;  %s584_s5 = inlined_call_operand.vmem [shape: f32[64,32], index: 5, kind: input, shape index: {}]   ;;  %s585_s6 = inlined_call_operand.vmem [shape: f32[1,32], index: 6, kind: input, shape index: {}]   ;;  %s586_s7 = inlined_call_operand.vmem [shape: f32[1,32], index: 7, kind: input, shape index: {}]   ;;  %s587_s8 = inlined_call_operand.<no memory space> [shape: f32[1,1], index: 8, kind: input, shape index: {}]   ;;  %s588_s9 = inlined_call_operand.hbm [shape: f32[1,8], index: 9, kind: output, shape index: {}]  }
   0x1   :  { %v35_v0 = vld [vmem:[%s580_s1] sm:$0xff]  ;;  %v36_v1 = vld [vmem:[%s580_s1 + $0x8] sm:$0xff]  ;;  %400 = vmatprep.subr.bf16.mxu1 %v451_v2  ;;  %367 = vmatprep.mubr.msk.f32.mxu1 %vm452_vm0, %v453_v4 }
   0x2   :  { %v401_v3 = vpack.c.bf16 %v36_v1, %v35_v0  ;;  %v119_v5 = vld [vmem:[%s582_s3] sm:$0xff]  ;;  %v120_v6 = vld [vmem:[%s582_s3 + $0x8] sm:$0xff]  ;;  %409 = vmatprep.subr.bf16.mxu0 %v451_v2  ;;  %397 = vmatprep.mubr.msk.f32.mxu0 %vm452_vm0, %v453_v4 }
   0x3   :  { %15 = vsyncpa [#allocation4], 0  ;;  %v34_v7 = vld [vmem:[%s579_s0] sm:$0xff]  ;;  %vm44_vm1 = vcmask 130048   ;;  %v404_v8 = vpack.c.bf16 %v120_v6, %v119_v5  ;;  %v121_v9 = vld [vmem:[%s582_s3 + $0x10] sm:$0xff]  ;;  %vm130_vm2 = vcmask 261120   ;;  %v315_v46 = vlaneseq }
   0x4   :  { %402 = vmatpush3.bf16.msra.mxu1 %v401_v3  ;;  %v122_v10 = vld [vmem:[%s582_s3 + $0x18] sm:$0xff]  ;;  %v338_v12 = vld [vmem:[%s581_s2] ss:$0 sm:$0xff]  ;;  %v211_v18 = vld [vmem:[%s584_s5 + $0x8] sm:$0xff]  ;;  %vm225_vm3 = vcmask 523264   ;;  %v312_v49 = vstv %s587_s8  ;;  %vm322_vm5 = vcmask 57344  }
   0x5   :  { %403 = vmatprep.subr.bf16.mxu1 %v451_v2  ;;  %v407_v11 = vpack.c.bf16 %v122_v10, %v121_v9  ;;  %v210_v17 = vld [vmem:[%s584_s5] sm:$0xff]  ;;  %v212_v20 = vld [vmem:[%s584_s5 + $0x10] sm:$0xff]  ;;  %v213_v21 = vld [vmem:[%s584_s5 + $0x18] sm:$0xff]  ;;  %v316_v47 = vand.u32 127, %v315_v46  ;;  %v318_v48 = vshrl.u32 %v315_v46, 7 }
   0x6   :  { %v410_v19 = vpack.c.bf16 %v211_v18, %v210_v17  ;;  %v214_v22 = vld [vmem:[%s584_s5 + $0x20] sm:$0xff]  ;;  %v413_v23 = vpack.c.bf16 %v213_v21, %v212_v20  ;;  %v215_v24 = vld [vmem:[%s584_s5 + $0x28] sm:$0xff]  ;;  %v216_v26 = vld [vmem:[%s584_s5 + $0x30] sm:$0xff] }
   0x7   :  { %368 = vmatmul.mubr.msk.f32.vlgmr.msra.gmra.mrb[0].mxu1 %vm44_vm1, %v34_v7  ;;  %v416_v25 = vpack.c.bf16 %v215_v24, %v214_v22  ;;  %v217_v27 = vld [vmem:[%s584_s5 + $0x38] sm:$0xff]  ;;  %v340_v29 = vld [vmem:[%s583_s4] ss:$0 sm:$0xff]  ;;  %v319_v50 = vsub.s32 %v316_v47, %v318_v48 }
   0x8   :  { %405 = vmatpush3.bf16.msra.mxu1 %v404_v8  ;;  %378 = vmatprep.mubr.msk.f32.mxu1 %vm452_vm0, %v453_v4  ;;  %v419_v28 = vpack.c.bf16 %v217_v27, %v216_v26  ;;  %v343_v38 = vld [vmem:[%s585_s6] ss:$0 sm:$0xff]  ;;  %s454_s6 = smov [#allocation3]  }
   0x9   :  { %406 = vmatprep.subr.bf16.mxu1 %v451_v2  ;;  %411 = vmatpush3.bf16.msra.mxu0 %v410_v19  ;;  %v345_v42 = vld [vmem:[%s586_s7] ss:$0 sm:$0xff]  ;;  %s330_s21 = sshll.u32 %s454_s6, 4  ;;  %s331_s21 = int_to_ptr.vmem [resolvable:$true] %s330_s21 }
   0xa   :  { %412 = vmatprep.subr.bf16.mxu0 %v451_v2  ;;  %s427_s7 = scalar_lea.vmem %s331_s21, 16  ;;  %s431_s22 = scalar_lea.vmem %s331_s21, 32 }
   0xb   :  { %p428_p0 = scmp.ne.s32.totalorder %s331_s21, %s427_s7  ;;  %p432_p1 = scmp.lt.s32.totalorder %s331_s21, %s331_s21 }
   0xc   :  { %408 = vmatpush3.bf16.msra.mxu1 %v407_v11  ;;  %p433_p2 = scmp.lt.s32.totalorder %s431_s22, %s427_s7 }
   0xd   :  { %414 = vmatpush3.bf16.msra.mxu0 %v413_v23 }
   0xe   :  { %415 = vmatprep.subr.bf16.mxu0 %v451_v2  ;;  %p434_p3 = por %p433_p2, %p432_p1 }
  0x10   :  { %p435_p4 = pnand %p434_p3, %p428_p0 }
  0x11   :  { %417 = vmatpush3.bf16.msra.mxu0 %v416_v25 }
  0x12   :  { %418 = vmatprep.subr.bf16.mxu0 %v451_v2 }
  0x15   :  { %420 = vmatpush3.bf16.msra.mxu0 %v419_v28 }
  0xda   :  { %v114_v13 = vpop.f32.mrb[0].mxu1 }
  0xdb   :  { %v115_v14 = vadd.f32 %v338_v12, %v114_v13  ;;  %v369_v15 = vpop.f32.mrb[1].mxu1 }
  0xdd   :  { %v118_v16 = vmax.f32 %v115_v14, 0.0 }
  0xdf   :  { %379 = vmatmul.mubr.msk.f32.vlgmr.msra.gmra.mrb[2].mxu1 %vm130_vm2, %v118_v16 }
 0x1b2   :  { %v200_v30 = vpop.f32.mrb[2].mxu1 }
 0x1b3   :  { %v201_v31 = vadd.f32 %v340_v29, %v200_v30  ;;  %v380_v32 = vpop.f32.mrb[3].mxu1 }
 0x1b5   :  { %v205_v33 = vmin.f32 %v201_v31, 0.0  ;;  %vm204_vm4 = vcmp.gt.f32.partialorder %v201_v31, 0.0 }
 0x1b7   :  { %v206_v34 = vmul.f32 1.442695, %v205_v33 }
 0x1b9   :  { %425 = vpow2.f32 %v206_v34 }
 0x1c3   :  { %v426_v35 = vpop.eup %425 }
 0x1c4   :  { %v342_v36 = vadd.f32 -1.0, %v426_v35 }
 0x1c6   :  { %v209_v37 = vsel %vm204_vm4, %v201_v31, %v342_v36 }
 0x1c7   :  { %398 = vmatmul.mubr.msk.f32.vlgmr.msra.gmra.mrb[0].mxu0 %vm225_vm3, %v209_v37 }
 0x29a   :  { %v295_v39 = vpop.f32.mrb[0].mxu0 }
 0x29b   :  { %v296_v40 = vadd.f32 %v343_v38, %v295_v39  ;;  %v399_v41 = vpop.f32.mrb[1].mxu0 }
 0x29d   :  { %v299_v43 = vmax.f32 %v296_v40, 0.0 }
 0x29f   :  { %v307_v44 = vmul.f32 %v345_v42, %v299_v43 }
 0x2a1   :  { %v308_v45 = vsel %vm130_vm2, %v307_v44, 0.0 }
 0x2a2   :  { %309 = vadd.xlane.f32.xlu0 %v308_v45 }
 0x32f   :  { %v310_v51 = vpop.xlane.xlu0 %309 }
 0x330   :  { %v313_v52 = vadd.f32 %v312_v49, %v310_v51 }
 0x332   :  { %v320_v53 = vrot.slane %v313_v52, %v319_v50 }
 0x334   :  { %323 = vst.msk [vmem:[#allocation3] sm:$0x1] %vm322_vm5, %v320_v53 }
 0x335   :  { %438 = shalt.err (!%p435_p4)
}
 0x336   :  { %s439_s8 = scalar_lea.hbm %s588_s9, 16 }
 0x337   :  { %p440_p5 = scmp.ne.s32.totalorder %s588_s9, %s439_s8  ;;  %p443_p6 = scmp.lt.u32.totalorder %s439_s8, %s588_s9 }
 0x339   :  { %p445_p7 = pnand %p443_p6, %p440_p5 }
 0x33b   :  { %448 = shalt.err (!%p445_p7)
}
 0x33c   :  { %333 = dma.vmem_to_hbm [thread:$0]  %s331_s21, 16, %s588_s9, [#allocation4]  }
 0x33d   :  { %449 = dma.done.wait [#allocation4], 16  }
 0x33e   :  { %450 = vsyncadd [#allocation4], 4294967280 }
 0x33f   :  { %337 = vsyncpa [#allocation4], 1 }

</bundles_post_ra>
